<compile_context>
chip_gen: v5e
topology: v5e:2x2
jax: 0.10.0
libtpu: 0.0.40
codegen_flags: <defaults>
</compile_context>

<pallas_src>
import jax
import jax.numpy as jnp
from jax.experimental import pallas as pl
from jax.experimental.pallas import tpu as pltpu

_LANE = 128
_SUBLANE = 8
_MAX_TILE_ROWS = 2048  # (2048, 128) f32 block = 1 MiB per pipeline buffer


def _copy_cast_kernel(src_ref, out_ref):
    # Identity render with dtype cast; no redundant zero-fill (the whole output
    # block is overwritten here).
    out_ref[...] = src_ref[...].astype(out_ref.dtype)


def _hbm_copy_kernel(src_hbm_ref, out_hbm_ref, sem):
    # Direct HBM->HBM DMA: the copy finishes entirely in the DMA engine.
    cp = pltpu.make_async_copy(src_hbm_ref, out_hbm_ref, sem)
    cp.start()
    cp.wait()


def dummy_diff_render(source_img: jax.Array, height: int, width: int) -> jax.Array:
    """Pallas equivalent of DummyDiffRender.forward.

    Args:
      source_img: (3, height, width) image, any float dtype.
      height, width: spatial dims of the result image.

    Returns:
      (3, height, width) float32 result image (identity render of source_img).
    """
    assert source_img.shape == (3, height, width), source_img.shape
    out_shape = (3, height, width)

    # ---- Fast path: no cast needed -> single HBM->HBM DMA (pure DMA-engine copy).
    if source_img.dtype == jnp.float32:
        return pl.pallas_call(
            _hbm_copy_kernel,
            out_shape=jax.ShapeDtypeStruct(out_shape, jnp.float32),
            in_specs=[pl.BlockSpec(memory_space=pl.ANY)],
            out_specs=pl.BlockSpec(memory_space=pl.ANY),
            scratch_shapes=[pltpu.SemaphoreType.DMA],
        )(source_img)

    # ---- General path: lane-dense tiled copy + in-kernel cast to float32.
    n = 3 * height * width
    # Pad the flat element count up to a multiple of (8 * 128) so the 2-D view
    # has a 128-wide lane dim and a sublane-aligned row count.  For typical
    # image sizes (W a multiple of 128) this pad is zero.
    pad = (-n) % (_SUBLANE * _LANE)
    flat = source_img.reshape(n)
    if pad:
        flat = jnp.pad(flat, (0, pad))
    rows = (n + pad) // _LANE                 # multiple of 8
    tile_rows = min(_MAX_TILE_ROWS, rows)     # multiple of 8 (or == full dim)
    grid = (pl.cdiv(rows, tile_rows),)        # partial last block is masked

    x2d = flat.reshape(rows, _LANE)
    out2d = pl.pallas_call(
        _copy_cast_kernel,
        out_shape=jax.ShapeDtypeStruct((rows, _LANE), jnp.float32),
        grid=grid,
        in_specs=[pl.BlockSpec((tile_rows, _LANE), lambda i: (i, 0))],
        out_specs=pl.BlockSpec((tile_rows, _LANE), lambda i: (i, 0)),
        compiler_params=pltpu.CompilerParams(
            dimension_semantics=("parallel",),  # shard rows across TCs on v7x
        ),
    )(x2d)

    return out2d.reshape(-1)[:n].reshape(out_shape)


if __name__ == "__main__":
    key = jax.random.PRNGKey(0)
    H, W = 16, 16
    src_f32 = jax.random.uniform(key, (3, H, W), dtype=jnp.float32)

    # Path 1: float32 source -> HBM->HBM DMA fast path.
    out_f32 = dummy_diff_render(src_f32, H, W)
    jax.block_until_ready(out_f32)
    assert out_f32.shape == (3, H, W)
    assert out_f32.dtype == jnp.float32
    assert bool(jnp.allclose(out_f32, src_f32))

    # Path 2: bf16 source -> tiled lane-dense copy with in-kernel cast.
    src_bf16 = src_f32.astype(jnp.bfloat16)
    out_from_bf16 = dummy_diff_render(src_bf16, H, W)
    jax.block_until_ready(out_from_bf16)
    assert out_from_bf16.shape == (3, H, W)
    assert out_from_bf16.dtype == jnp.float32
    assert bool(jnp.allclose(out_from_bf16, src_bf16.astype(jnp.float32)))

    print("KERNEL_OK")
</pallas_src>

<mosaic_0001>
module attributes {stable_mosaic.version = 11 : i64} {
  func.func @_hbm_copy_kernel(%arg0: memref<3x16x16xf32, #tpu.memory_space<any>>, %arg1: memref<3x16x16xf32, #tpu.memory_space<any>>, %arg2: memref<!tpu.dma_semaphore, #tpu.memory_space<semaphore_mem>>) attributes {dimension_semantics = [], scalar_prefetch = 0 : i64, scratch_operands = 1 : i64, tpu.core_type = #tpu.core_type<tc>} {
    tpu.enqueue_dma source(%arg0 : memref<3x16x16xf32, #tpu.memory_space<any>>) target(%arg1 : memref<3x16x16xf32, #tpu.memory_space<any>>) target_semaphore(%arg2 : memref<!tpu.dma_semaphore, #tpu.memory_space<semaphore_mem>>)
    tpu.wait_dma2 semaphore(%arg2 : memref<!tpu.dma_semaphore, #tpu.memory_space<semaphore_mem>>) src(%arg0 : memref<3x16x16xf32, #tpu.memory_space<any>>) dst(%arg1 : memref<3x16x16xf32, #tpu.memory_space<any>>)
    return
  }
}

</mosaic_0001>

<bundles_post_ra>
// kernel: tpu_custom_call.1
= control target key start
LH: loop header
LB: loop body
LE: loop exit
PB: predicated region body
PF: predicated region fallthrough
CT: control target
= control target key end

     0   :  { %s33_s12 = smov [#allocation2]   ;;  %s34_s13 = smov [#allocation3]   ;;  %s52_s0 = inlined_call_operand.hbm [shape: f32[3,16,16], index: 0, kind: input, shape index: {}]   ;;  %s53_s1 = inlined_call_operand.hbm [shape: f32[3,16,16], index: 1, kind: output, shape index: {}]  }
   0x1   :  { %s10_s8 = sshll.u32 %s52_s0, 4  ;;  %s12_s11 = sshll.u32 %s53_s1, 4  ;;  %s11_s8 = int_to_ptr.hbm [resolvable:$true] %s10_s8  ;;  %s13_s11 = int_to_ptr.hbm [resolvable:$true] %s12_s11 }
   0x2   :  { %s35_s14 = smov 0  }
   0x3   :  { %16 = dma.general %s11_s8, 768, %s13_s11, %s33_s12, %s34_s13, [#allocation4], %s35_s14, 0  }
   0x4   :  { %31 = dma.done.wait [#allocation2], 768 }
   0x5   :  { %32 = vsyncadd [#allocation2], 4294966528 }
   0x6   :  { %21 = vsyncmov [#allocation2] }
   0x9   :  { %s22_s15 = vpop.sfrf %21 }
   0xa   :  { %p27_p0 = scmp.ne.s32.totalorder %s22_s15, 0 }
   0xc   :  { %26 = shalt.err (%p27_p0)  }

</bundles_post_ra>
